<compile_context>
chip_gen: v5e
topology: v5e:2x2
jax: 0.10.0
libtpu: 0.0.40
codegen_flags: <defaults>
</compile_context>

<pallas_src>
import jax
import jax.numpy as jnp
from jax.experimental import pallas as pl
from jax.experimental.pallas import tpu as pltpu


def _round_up(x, m):
    return (x + m - 1) // m * m


# ---------------------------------------------------------------------------
# Kernels
# ---------------------------------------------------------------------------
def _kernel_shortcut(x_ref, w0_ref, b0_ref, wcat_ref, b1_ref, o_ref):
    """Linear-shortcut variant.

    wcat packs [W1; Ws] along its row axis so that
      concat([relu(net), x]) @ wcat == relu(net) @ W1 + x @ Ws
    which fuses the fc_1 matmul and the shortcut matmul into one MXU op.
    """
    x = x_ref[...]
    h0 = jnp.maximum(x, 0.0).astype(w0_ref.dtype)                 # actvn(x)
    net = jnp.dot(h0, w0_ref[...],
                  preferred_element_type=jnp.float32) + b0_ref[...]
    h1 = jnp.maximum(net, 0.0).astype(wcat_ref.dtype)             # actvn(net)
    lhs = jnp.concatenate([h1, x.astype(wcat_ref.dtype)], axis=-1)
    out = jnp.dot(lhs, wcat_ref[...],
                  preferred_element_type=jnp.float32) + b1_ref[...]
    o_ref[...] = out.astype(o_ref.dtype)


def _kernel_identity(x_ref, w0_ref, b0_ref, w1_ref, b1_ref, o_ref):
    """Identity-shortcut variant (size_in == size_out)."""
    x = x_ref[...]
    h0 = jnp.maximum(x, 0.0).astype(w0_ref.dtype)
    net = jnp.dot(h0, w0_ref[...],
                  preferred_element_type=jnp.float32) + b0_ref[...]
    h1 = jnp.maximum(net, 0.0).astype(w1_ref.dtype)
    dx = jnp.dot(h1, w1_ref[...],
                 preferred_element_type=jnp.float32) + b1_ref[...]
    o_ref[...] = (x.astype(jnp.float32) + dx).astype(o_ref.dtype)


# ---------------------------------------------------------------------------
# Wrapper
# ---------------------------------------------------------------------------
def _choose_tm(n8, in_p, h_p, out_p, weight_bytes,
               *, budget_bytes=40 * 1024 * 1024, tm_default=1024):
    """Largest row tile that keeps resident weights + double-buffered tiles +
    in-kernel f32 intermediates under a v7x-safe VMEM budget."""
    tm = max(8, _round_up(min(tm_default, n8), 8))
    while tm > 8:
        act = 2 * 2 * tm * (in_p + out_p) * 4          # 2x-buffered x/out tiles
        interm = tm * (2 * h_p + in_p + out_p) * 4     # net/h1/lhs/out f32 temps
        if weight_bytes + act + interm <= budget_bytes:
            break
        tm = max(8, _round_up(tm // 2, 8))
    return tm


def resnet_block_fc(x, params, *, tm=None, weights_dtype=None):
    """ResnetBlockFC forward pass with a single Pallas call.

    x: [..., size_in] float32 (leading dims are flattened into the batch)
    params: dict with keys
        w0 (size_in, size_h), b0 (1, size_h),
        w1 (size_h, size_out), b1 (1, size_out),
        and optionally ws (size_in, size_out) when size_in != size_out.
    tm: row-tile size (sweepable); auto-chosen if None.
    weights_dtype: e.g. jnp.bfloat16 to run the MXU in bf16 (f32 accumulation).
    """
    *lead, size_in = x.shape
    x2 = x.reshape(-1, size_in)
    n = x2.shape[0]
    size_h = params["w0"].shape[1]
    size_out = params["w1"].shape[1]
    has_shortcut = "ws" in params
    wdt = jnp.dtype(weights_dtype) if weights_dtype is not None \
        else jnp.dtype(params["w0"].dtype)

    # --- Lane-dense padding of feature dims (zero padding is exact). -------
    in_p = _round_up(size_in, 128)
    h_p = _round_up(size_h, 128)
    out_p = _round_up(size_out, 128)

    w0 = jnp.zeros((in_p, h_p), wdt).at[:size_in, :size_h].set(
        params["w0"].astype(wdt))
    b0 = jnp.zeros((1, h_p), jnp.float32).at[:, :size_h].set(
        params["b0"].astype(jnp.float32))
    b1 = jnp.zeros((1, out_p), jnp.float32).at[:, :size_out].set(
        params["b1"].astype(jnp.float32))

    if has_shortcut:
        # Pack [W1; Ws] so the kernel fuses dx and x_s into one matmul.
        k2 = h_p + in_p
        w_second = jnp.zeros((k2, out_p), wdt)
        w_second = w_second.at[:size_h, :size_out].set(params["w1"].astype(wdt))
        w_second = w_second.at[h_p:h_p + size_in, :size_out].set(
            params["ws"].astype(wdt))
        kernel = _kernel_shortcut
    else:
        k2 = h_p
        w_second = jnp.zeros((k2, out_p), wdt).at[:size_h, :size_out].set(
            params["w1"].astype(wdt))
        kernel = _kernel_identity

    wbytes = (in_p * h_p + k2 * out_p) * wdt.itemsize + (h_p + out_p) * 4

    # --- Row tiling over the batch dimension. ------------------------------
    n8 = _round_up(max(n, 1), 8)
    if tm is None:
        tm = _choose_tm(n8, in_p, h_p, out_p, wbytes)
    tm = max(8, _round_up(min(tm, n8), 8))
    n_pad = _round_up(n, tm)
    grid_n = n_pad // tm

    # Only pad when shapes are misaligned (avoids an extra HBM copy).
    if n_pad != n or in_p != size_in:
        x_p = jnp.zeros((n_pad, in_p), x2.dtype).at[:n, :size_in].set(x2)
    else:
        x_p = x2

    # --- Cost estimate (advisory). -----------------------------------------
    flops = 2 * n * (size_in * size_h + size_h * size_out
                     + (size_in * size_out if has_shortcut else 0))
    bytes_accessed = (n * size_in + n * size_out) * 4 + wbytes
    cost = pl.CostEstimate(flops=int(flops), transcendentals=0,
                           bytes_accessed=int(bytes_accessed))

    # VMEM limit: resident weights + double-buffered tiles + f32 temps,
    # with headroom, capped at v7x's 64 MiB physical VMEM.
    vmem_need = (wbytes
                 + 2 * 2 * tm * (in_p + out_p) * 4
                 + tm * (2 * h_p + in_p + out_p) * 4
                 + (2 << 20))
    vmem_limit = min(64 * 1024 * 1024, max(16 * 1024 * 1024, int(vmem_need)))

    # TODO(synk): for very large size_h (>~2048) add a K-tiled grid axis with
    # an f32 accumulator scratch instead of holding full weights resident.
    out = pl.pallas_call(
        kernel,
        out_shape=jax.ShapeDtypeStruct((n_pad, out_p), x.dtype),
        grid=(grid_n,),
        in_specs=[
            pl.BlockSpec((tm, in_p), lambda i: (i, 0)),    # x tile (streamed)
            pl.BlockSpec((in_p, h_p), lambda i: (0, 0)),   # w0 (resident)
            pl.BlockSpec((1, h_p), lambda i: (0, 0)),      # b0 (resident)
            pl.BlockSpec((k2, out_p), lambda i: (0, 0)),   # w1 / [w1;ws]
            pl.BlockSpec((1, out_p), lambda i: (0, 0)),    # b1 (resident)
        ],
        out_specs=pl.BlockSpec((tm, out_p), lambda i: (i, 0)),
        compiler_params=pltpu.CompilerParams(
            dimension_semantics=("parallel",),
            vmem_limit_bytes=vmem_limit,
        ),
        cost_estimate=cost,
    )(x_p, w0, b0, w_second, b1)

    if n_pad != n or out_p != size_out:
        out = out[:n, :size_out]
    return out.reshape(*lead, size_out)


# ---------------------------------------------------------------------------
# Parameter init (mirrors the PyTorch module's shapes / zero-init of fc_1)
# ---------------------------------------------------------------------------
def init_params(key, size_in, size_out=None, size_h=None):
    if size_out is None:
        size_out = size_in
    if size_h is None:
        size_h = min(size_in, size_out)

    k0w, k0b, k1b, ksw = jax.random.split(key, 4)
    w0 = (jax.random.normal(k0w, (size_in, size_h), jnp.float32)
          * (1.0 / jnp.sqrt(size_in)))
    b0 = jax.random.normal(k0b, (1, size_h), jnp.float32) * 0.01
    w1 = jnp.zeros((size_h, size_out), jnp.float32)      # nn.init.zeros_
    b1 = jax.random.normal(k1b, (1, size_out), jnp.float32) * 0.01

    params = {"w0": w0, "b0": b0, "w1": w1, "b1": b1}
    if size_in != size_out:
        params["ws"] = (jax.random.normal(ksw, (size_in, size_out), jnp.float32)
                        * (1.0 / jnp.sqrt(size_in)))
    return params


def _reference(x, params):
    """Plain-JAX reference for correctness checking."""
    h0 = jnp.maximum(x, 0.0)
    net = h0 @ params["w0"] + params["b0"]
    dx = jnp.maximum(net, 0.0) @ params["w1"] + params["b1"]
    x_s = x @ params["ws"] if "ws" in params else x
    return x_s + dx


if __name__ == "__main__":
    key = jax.random.PRNGKey(0)
    kx1, kx2, kx3, kp1, kp2 = jax.random.split(key, 5)

    # Case 1: size_in != size_out (fused linear-shortcut path), grid over N,
    # N not a multiple of the tile, feature dims not multiples of 128.
    n, size_in, size_out, size_h = 300, 32, 64, 32
    x = jax.random.normal(kx1, (n, size_in), jnp.float32)
    params = init_params(kp1, size_in, size_out, size_h)
    out = jax.block_until_ready(resnet_block_fc(x, params, tm=64))
    ref = _reference(x, params)
    assert out.shape == (n, size_out)
    assert jnp.allclose(out, ref, atol=1e-5, rtol=1e-5)

    # Case 2: size_in == size_out (identity shortcut path), tiny batch.
    n2 = 8
    x2 = jax.random.normal(kx2, (n2, size_in), jnp.float32)
    params2 = init_params(kp2, size_in)   # size_out = size_h = size_in
    out2 = jax.block_until_ready(resnet_block_fc(x2, params2))
    ref2 = _reference(x2, params2)
    assert out2.shape == (n2, size_in)
    assert jnp.allclose(out2, ref2, atol=1e-5, rtol=1e-5)

    # Case 3: bf16 MXU path (f32 accumulation) — looser tolerance vs f32 ref.
    out3 = jax.block_until_ready(
        resnet_block_fc(x, params, tm=64, weights_dtype=jnp.bfloat16))
    assert out3.shape == (n, size_out)
    assert jnp.allclose(out3, ref, atol=5e-2, rtol=5e-2)

    # Case 4: leading dims are flattened like the module's [..., size_in] use.
    x4 = jax.random.normal(kx3, (2, 10, size_in), jnp.float32)
    out4 = jax.block_until_ready(resnet_block_fc(x4, params))
    ref4 = _reference(x4.reshape(-1, size_in), params).reshape(2, 10, size_out)
    assert out4.shape == (2, 10, size_out)
    assert jnp.allclose(out4, ref4, atol=1e-5, rtol=1e-5)

    print("KERNEL_OK")
</pallas_src>

<mosaic_0001>
module attributes {stable_mosaic.version = 11 : i64} {
  func.func @_kernel_shortcut(%arg0: i32, %arg1: memref<64x128xf32, #tpu.memory_space<vmem>>, %arg2: memref<128x128xf32, #tpu.memory_space<vmem>>, %arg3: memref<1x128xf32, #tpu.memory_space<vmem>>, %arg4: memref<256x128xf32, #tpu.memory_space<vmem>>, %arg5: memref<1x128xf32, #tpu.memory_space<vmem>>, %arg6: memref<64x128xf32, #tpu.memory_space<vmem>>) attributes {dimension_semantics = [#tpu.dimension_semantics<parallel>], iteration_bounds = array<i64: 5>, scalar_prefetch = 0 : i64, scratch_operands = 0 : i64, tpu.core_type = #tpu.core_type<tc>, window_params = [{transform_indices = @transform_0, window_bounds = array<i64: 64, 128>}, {pipeline_mode = #tpu.pipeline_mode<synchronous>, transform_indices = @transform_1, window_bounds = array<i64: 128, 128>}, {pipeline_mode = #tpu.pipeline_mode<synchronous>, transform_indices = @transform_2, window_bounds = array<i64: 1, 128>}, {pipeline_mode = #tpu.pipeline_mode<synchronous>, transform_indices = @transform_3, window_bounds = array<i64: 256, 128>}, {pipeline_mode = #tpu.pipeline_mode<synchronous>, transform_indices = @transform_4, window_bounds = array<i64: 1, 128>}, {transform_indices = @transform_5, window_bounds = array<i64: 64, 128>}]} {
    %c0 = arith.constant 0 : index
    %c0_0 = arith.constant 0 : index
    %0 = vector.load %arg1[%c0, %c0_0] : memref<64x128xf32, #tpu.memory_space<vmem>>, vector<64x128xf32>
    %cst = arith.constant 0.000000e+00 : f32
    %1 = vector.broadcast %cst : f32 to vector<64x128xf32>
    %2 = arith.maximumf %0, %1 : vector<64x128xf32>
    %c0_1 = arith.constant 0 : index
    %c0_2 = arith.constant 0 : index
    %3 = vector.load %arg2[%c0_1, %c0_2] : memref<128x128xf32, #tpu.memory_space<vmem>>, vector<128x128xf32>
    %cst_3 = arith.constant dense<0.000000e+00> : vector<64x128xf32>
    %4 = tpu.matmul %2, %3, %cst_3 {dimension_numbers = #tpu.dot_dimension_numbers<[1], [0], [0], [1], [0, 0, 1, 1], [], []>} : vector<64x128xf32>, vector<128x128xf32>, vector<64x128xf32> -> vector<64x128xf32>
    %c0_4 = arith.constant 0 : index
    %c0_5 = arith.constant 0 : index
    %5 = vector.load %arg3[%c0_4, %c0_5] : memref<1x128xf32, #tpu.memory_space<vmem>>, vector<1x128xf32>
    %6 = vector.broadcast %5 : vector<1x128xf32> to vector<64x128xf32>
    %7 = arith.addf %4, %6 : vector<64x128xf32>
    %cst_6 = arith.constant 0.000000e+00 : f32
    %8 = vector.broadcast %cst_6 : f32 to vector<64x128xf32>
    %9 = arith.maximumf %7, %8 : vector<64x128xf32>
    %10 = tpu.concatenate %9, %0 in 1 : vector<64x128xf32>, vector<64x128xf32> -> vector<64x256xf32>
    %c0_7 = arith.constant 0 : index
    %c0_8 = arith.constant 0 : index
    %11 = vector.load %arg4[%c0_7, %c0_8] : memref<256x128xf32, #tpu.memory_space<vmem>>, vector<256x128xf32>
    %cst_9 = arith.constant dense<0.000000e+00> : vector<64x128xf32>
    %12 = tpu.matmul %10, %11, %cst_9 {dimension_numbers = #tpu.dot_dimension_numbers<[1], [0], [0], [1], [0, 0, 1, 1], [], []>} : vector<64x256xf32>, vector<256x128xf32>, vector<64x128xf32> -> vector<64x128xf32>
    %c0_10 = arith.constant 0 : index
    %c0_11 = arith.constant 0 : index
    %13 = vector.load %arg5[%c0_10, %c0_11] : memref<1x128xf32, #tpu.memory_space<vmem>>, vector<1x128xf32>
    %14 = vector.broadcast %13 : vector<1x128xf32> to vector<64x128xf32>
    %15 = arith.addf %12, %14 : vector<64x128xf32>
    %c0_12 = arith.constant 0 : index
    %c0_13 = arith.constant 0 : index
    %16 = vector.load %arg6[%c0_12, %c0_13] : memref<64x128xf32, #tpu.memory_space<vmem>>, vector<64x128xf32>
    tpu.vector_store %arg6[%c0_12, %c0_13], %15 {strides = array<i32>} : memref<64x128xf32, #tpu.memory_space<vmem>>, vector<64x128xf32>,
    return
  }
  func.func @transform_0(%arg0: i32) -> (i32, i32) {
    %c0_i32 = arith.constant 0 : i32
    %c0_i32_0 = arith.constant 0 : i32
    return %arg0, %c0_i32 : i32, i32
  }
  func.func @transform_1(%arg0: i32) -> (i32, i32) {
    %c0_i32 = arith.constant 0 : i32
    %c0_i32_0 = arith.constant 0 : i32
    %c0_i32_1 = arith.constant 0 : i32
    return %c0_i32, %c0_i32_0 : i32, i32
  }
  func.func @transform_2(%arg0: i32) -> (i32, i32) {
    %c0_i32 = arith.constant 0 : i32
    %c0_i32_0 = arith.constant 0 : i32
    %c0_i32_1 = arith.constant 0 : i32
    return %c0_i32, %c0_i32_0 : i32, i32
  }
  func.func @transform_3(%arg0: i32) -> (i32, i32) {
    %c0_i32 = arith.constant 0 : i32
    %c0_i32_0 = arith.constant 0 : i32
    %c0_i32_1 = arith.constant 0 : i32
    return %c0_i32, %c0_i32_0 : i32, i32
  }
  func.func @transform_4(%arg0: i32) -> (i32, i32) {
    %c0_i32 = arith.constant 0 : i32
    %c0_i32_0 = arith.constant 0 : i32
    %c0_i32_1 = arith.constant 0 : i32
    return %c0_i32, %c0_i32_0 : i32, i32
  }
  func.func @transform_5(%arg0: i32) -> (i32, i32) {
    %c0_i32 = arith.constant 0 : i32
    %c0_i32_0 = arith.constant 0 : i32
    return %arg0, %c0_i32 : i32, i32
  }
}

</mosaic_0001>

<bundles_post_ra>
// kernel: tpu_custom_call.1
= control target key start
LH: loop header
LB: loop body
LE: loop exit
PB: predicated region body
PF: predicated region fallthrough
CT: control target
= control target key end

     0   :  { %10 = vsyncpa [#allocation3], 0  ;;  %s1121_s0 = inlined_call_operand.hbm [shape: f32[320,128], index: 0, kind: input, shape index: {}]   ;;  %s1122_s1 = inlined_call_operand.hbm [shape: f32[128,128], index: 1, kind: input, shape index: {}]   ;;  %s1123_s2 = inlined_call_operand.vmem [shape: f32[1,128], index: 2, kind: input, shape index: {}]   ;;  %s1124_s3 = inlined_call_operand.hbm [shape: f32[256,128], index: 3, kind: input, shape index: {}]   ;;  %s1125_s4 = inlined_call_operand.vmem [shape: f32[1,128], index: 4, kind: input, shape index: {}]   ;;  %s1126_s5 = inlined_call_operand.hbm [shape: f32[320,128], index: 5, kind: output, shape index: {}]  }
   0x1   :  { %12 = vsyncpa [#allocation3 + $0x1], 0 }
   0x2   :  { %13 = vsyncpa [#allocation6], 0 }
   0x3   :  { %14 = vsyncpa [#allocation4], 0 }
   0x4   :  { %16 = vsyncpa [#allocation4 + $0x1], 0  ;;  %s922_s18 = smov 0   ;;  %s924_s19 = smov 0  }
   0x5   :  { %s926_s20 = smov 0   ;;  %s928_s21 = smov 0  }
   0x6 LB: > { %s943_s22 = sadd.s32 4294967295, %s884_s21   ;;  %s599_s23 = sadd.s32 4294967294, %s884_s21   ;;  %s884_s21 = sphi %s928_s21, %s1137_s21   ;;  %s880_s20 = sphi %s926_s20, %s1136_s20   ;;  %s876_s19 = sphi %s924_s19, %s1135_s19   ;;  %s872_s18 = sphi %s922_s18, %s1134_s18  }
   0x7   : > { %p42_p0 = scmp.ne.s32.totalorder %s876_s19, %s872_s18  ;;  %p43_p1 = scmp.eq.s32.totalorder %s943_s22, 0 }
   0x8   : > { %p150_p2 = scmp.eq.s32.totalorder %s943_s22, 4  ;;  %p156_p3 = scmp.eq.s32.totalorder %s599_s23, 4 }
   0x9   : > { %p952_p4 = por %p43_p1, %p42_p0  ;;  %p600_p5 = scmp.ge.s32.totalorder %s884_s21, 1 }
   0xa   : > { %p957_p6 = por %p156_p3, %p42_p0  ;;  %p163_p7 = scmp.lt.s32.totalorder %s884_s21, 6 }
   0xb   : > { %s174_s28 = sshll.u32 %s1122_s1, 4  ;;  %s886_s30 = smov [#allocation5]   ;;  %s175_s28 = int_to_ptr.hbm [resolvable:$true] %s174_s28 }
   0xc   : > { %p965_p8 = pnand %p600_p5, %p163_p7  ;;  %s176_s6 = sshll.u32 %s886_s30, 4  ;;  %s177_s6 = int_to_ptr.vmem [resolvable:$true] %s176_s6 }
   0xd   : > { %s191_s9 = sshll.u32 %s1124_s3, 4  ;;  %s1127_s10 = smov 128   ;;  %s192_s9 = int_to_ptr.hbm [resolvable:$true] %s191_s9 }
   0xe   : > { %p663_p9 = pneg %p965_p8  ;;  %s888_s11 = smov 8  }
   0xf   : > { %s889_s12 = smov [#allocation7]   ;;  %s983_s14 = sadd.s32 1, %s884_s21  }
  0x10   : > { %p664_p10 = pnand %p663_p9, %p43_p1  ;;  %s193_s13 = sshll.u32 %s889_s12, 4  ;;  %s194_s13 = int_to_ptr.vmem [resolvable:$true] %s193_s13 }
  0x11   : > { %s29_s15 = sadd.s32 1, %s880_s20  ;;  %s26_s16 = ssub.s32 %s884_s21, %s983_s14 }
  0x12   : > { %666 = dma.hbm_to_vmem [thread:$0]  (!%p664_p10), %s175_s28, 2048, %s177_s6, [#allocation6], %s1127_s10, %s1127_s10, %s888_s11  }
  0x13   : > { %669 = dma.hbm_to_vmem [thread:$0]  (!%p664_p10), %s192_s9, 4096, %s194_s13, [#allocation6], %s1127_s10, %s1127_s10, %s888_s11  }
  0x14   : > { %p36_p11 = scmp.ne.s32.totalorder %s880_s20, %s876_s19  ;;  %p27_p12 = scmp.eq.s32.totalorder %s26_s16, 0 }
  0x15   : > { %p37_p13 = scmp.eq.s32.totalorder %s884_s21, 0  ;;  %p680_p3 = scmp.lt.s32.totalorder %s884_s21, 5 }
  0x16   : > { %p993_p0 = por %p150_p2, %p36_p11  ;;  %s210_s26 = sand.u32 1, %s880_s20  }
  0x17   : > { %s999_s23 = scalar_select %p27_p12, %s880_s20, %s29_s15  }
  0x18   : > { %p38_p5 = por %p37_p13, %p36_p11  ;;  %s604_s27 = sshll.u32 %s210_s26, 6 }
  0x19   : > { %s617_s28 = sshll.u32 %s884_s21, 6  ;;  %s214_s8 = scalar_lea.vmem [#allocation2], %s604_s27 }
  0x1a   : > { %s219_s7 = scalar_lea.hbm %s1121_s0, %s617_s28  ;;  %s222_s9 = sshll.u32 %s214_s8, 4  ;;  %s223_s9 = int_to_ptr.vmem [resolvable:$true] %s222_s9 }
  0x1b   : > { %s220_s12 = sshll.u32 %s219_s7, 4  ;;  %p1006_p2 = pnand %p680_p3, %p38_p5  ;;  %s221_s12 = int_to_ptr.hbm [resolvable:$true] %s220_s12 }
  0x1c   : > { %s211_s15 = scalar_lea.sflag [#allocation3], %s210_s26  ;;  %s784_s16 = sshra.s32 %s221_s12, 4  ;;  %s785_s16 = int_to_ptr.hbm [resolvable:$true] %s784_s16 }
  0x1d   : > { %s786_s10 = scalar_lea.hbm %s785_s16, 64  ;;  %p788_p9 = pneg %p1006_p2 }
  0x1e   : > { %p787_p7 = scmp.ne.s32.totalorder %s785_s16, %s786_s10  ;;  %s791_s30 = scalar_lea.hbm %s1121_s0, 320 }
  0x1f   : > { %p792_p12 = scmp.lt.s32.totalorder %s785_s16, %s1121_s0  ;;  %p793_p13 = scmp.lt.s32.totalorder %s791_s30, %s786_s10 }
  0x20   : > { %p789_p10 = pnand %p788_p9, %p787_p7 }
  0x21   : > { %p794_p3 = por %p793_p13, %p792_p12 }
  0x22   : > { %p790_p11 = pneg %p789_p10 }
  0x24   : > { %p795_p5 = pnand %p794_p3, %p790_p11 }
  0x26   : > { %798 = shalt.err (!%p795_p5)
}
  0x27   : > { %s1133_s26 = smov 128   ;;  %234 = sbr.rel (%p965_p8) target bundleno = 391 (0x187), region = 40 }
  0x28   : > { %673 = dma.hbm_to_vmem [thread:$0]  (!%p1006_p2), %s221_s12, 1024, %s223_s9, %s211_s15, %s1133_s26, %s1133_s26, %s888_s11  }
  0x29   : > { %s1026_s8 = sand.u32 (!%p965_p8), 1, %s876_s19  }
  0x2a   : > { %s608_s10 = sshll.u32 (!%p965_p8), %s1026_s8, 6  ;;  %s237_s16 = scalar_lea.sflag (!%p965_p8), [#allocation3], %s1026_s8 }
  0x2b   : > { %s1032_s28 = scalar_lea.vmem (!%p965_p8), [#allocation2], %s608_s10 }
  0x2c   : > { %859 = dma.done.wait (%p952_p4), %s237_s16, 1024  }
  0x2d   : > { %861 = vsyncadd (%p952_p4), %s237_s16, 4294966272 }
  0x2e   : > { %863 = dma.done.wait (%p43_p1), [#allocation6], 6144  }
  0x2f   : > { %865 = vsyncadd (%p43_p1), [#allocation6], 4294961152  ;;  %v311_v0 = vld [vmem:[#allocation5 + $0x78] sm:$0xff]  ;;  %v310_v1 = vld [vmem:[#allocation5 + $0x70] sm:$0xff]  ;;  %s1078_s12 = scalar_lea.vmem [#allocation8], %s608_s10  ;;  %s618_s13 = sshll.u32 %s943_s22, 6 }
  0x30   : > { %316 = vmatpush.msra.mxu0 %v311_v0  ;;  %619 = vmatpush.msra.mxu3 %v311_v0  ;;  %v309_v2 = vld [vmem:[#allocation5 + $0x68] sm:$0xff]  ;;  %v308_v3 = vld [vmem:[#allocation5 + $0x60] sm:$0xff]  ;;  %v307_v4 = vld [vmem:[#allocation5 + $0x58] sm:$0xff]  ;;  %s503_s30 = scalar_lea.hbm %s1126_s5, %s618_s13  ;;  %s504_s6 = sshll.u32 %s1078_s12, 4  ;;  %s505_s6 = int_to_ptr.vmem [resolvable:$true] %s504_s6 }
  0x31   : > { %v306_v5 = vld [vmem:[#allocation5 + $0x50] sm:$0xff]  ;;  %v305_v6 = vld [vmem:[#allocation5 + $0x48] sm:$0xff]  ;;  %v304_v7 = vld [vmem:[#allocation5 + $0x40] sm:$0xff]  ;;  %s506_s7 = sshll.u32 %s503_s30, 4  ;;  %s492_s26 = scalar_lea.sflag [#allocation4], %s1026_s8  ;;  %s507_s7 = int_to_ptr.hbm [resolvable:$true] %s506_s7 }
  0x32   : > { %317 = vmatpush.msra.mxu0 %v310_v1  ;;  %620 = vmatpush.msra.mxu3 %v310_v1  ;;  %v303_v8 = vld [vmem:[#allocation5 + $0x38] sm:$0xff]  ;;  %v302_v9 = vld [vmem:[#allocation5 + $0x30] sm:$0xff]  ;;  %v301_v10 = vld [vmem:[#allocation5 + $0x28] sm:$0xff]  ;;  %s828_s10 = sshra.s32 %s507_s7, 4  ;;  %s834_s24 = scalar_lea.hbm %s1126_s5, 320  ;;  %s829_s10 = int_to_ptr.hbm [resolvable:$true] %s828_s10 }
  0x33   : > { %v300_v11 = vld [vmem:[#allocation5 + $0x20] sm:$0xff]  ;;  %v299_v12 = vld [vmem:[#allocation5 + $0x18] sm:$0xff]  ;;  %v298_v13 = vld [vmem:[#allocation5 + $0x10] sm:$0xff]  ;;  %s830_s16 = scalar_lea.hbm %s829_s10, 64  ;;  %p835_p2 = scmp.lt.s32.totalorder %s829_s10, %s1126_s5 }
  0x34   : > { %318 = vmatpush.msra.mxu0 %v309_v2  ;;  %621 = vmatpush.msra.mxu3 %v309_v2  ;;  %v1043_v14 = vld [vmem:[%s1032_s28] sm:$0xff]  ;;  %v1046_v15 = vld [vmem:[%s1032_s28 + $0x30] sm:$0xff]  ;;  %v297_v16 = vld [vmem:[#allocation5 + $0x8] sm:$0xff]  ;;  %p831_p1 = scmp.ne.s32.totalorder %s829_s10, %s830_s16  ;;  %p836_p7 = scmp.lt.s32.totalorder %s834_s24, %s830_s16 }
  0x35   : > { %v296_v17 = vld [vmem:[#allocation5] sm:$0xff]  ;;  %v288_v18 = vmax.f32 %v1043_v14, 0.0  ;;  %v294_v19 = vmax.f32 %v1046_v15, 0.0  ;;  %v1051_v20 = vld [vmem:[%s1032_s28 + $0x8] sm:$0xff]  ;;  %v1054_v21 = vld [vmem:[%s1032_s28 + $0x38] sm:$0xff] }
  0x36   : > { %319 = vmatpush.msra.mxu0 %v308_v3  ;;  %622 = vmatpush.msra.mxu3 %v308_v3  ;;  %v289_v22 = vmax.f32 %v1051_v20, 0.0  ;;  %v295_v23 = vmax.f32 %v1054_v21, 0.0  ;;  %v396_v24 = vld [vmem:[#allocation7 + $0xf8] sm:$0xff]  ;;  %v395_v25 = vld [vmem:[#allocation7 + $0xf0] sm:$0xff]  ;;  %v394_v27 = vld [vmem:[#allocation7 + $0xe8] sm:$0xff]  ;;  %p832_p4 = pnand %p831_p1, %p993_p0  ;;  %p837_p9 = por %p836_p7, %p835_p2 }
  0x37   : > { %v1059_v26 = vld [vmem:[%s1032_s28 + $0x10] sm:$0xff]  ;;  %442 = vmatpush.msra.mxu2 %v396_v24  ;;  %v380_v28 = vld [vmem:[#allocation7 + $0x78] sm:$0xff]  ;;  %v393_v31 = vld [vmem:[#allocation7 + $0xe0] sm:$0xff] }
  0x38   : > { %320 = vmatpush.msra.mxu0 %v307_v4  ;;  %623 = vmatpush.msra.mxu3 %v307_v4  ;;  %v379_v29 = vld [vmem:[#allocation7 + $0x70] sm:$0xff]  ;;  %v290_v30 = vmax.f32 %v1059_v26, 0.0  ;;  %v378_v32 = vld [vmem:[#allocation7 + $0x68] sm:$0xff]  ;;  %v392_v33 = vld [vmem:[#allocation7 + $0xd8] sm:$0xff]  ;;  %p833_p8 = pneg %p832_p4 }
  0x39   : > { %443 = vmatpush.msra.mxu2 %v395_v25  ;;  %401 = vmatpush.msra.mxu1 %v380_v28  ;;  %v377_v34 = vld [vmem:[#allocation7 + $0x60] sm:$0xff]  ;;  %v391_v35 = vld [vmem:[#allocation7 + $0xd0] sm:$0xff]  ;;  %v376_v36 = vld [vmem:[#allocation7 + $0x58] sm:$0xff] }
  0x3a   : > { %321 = vmatpush.msra.mxu0 %v306_v5  ;;  %624 = vmatpush.msra.mxu3 %v306_v5  ;;  %v283_v37 = vld [vmem:[%s1032_s28 + $0x18] sm:$0xff]  ;;  %v390_v38 = vld [vmem:[#allocation7 + $0xc8] sm:$0xff]  ;;  %v375_v39 = vld [vmem:[#allocation7 + $0x50] sm:$0xff]  ;;  %p838_p10 = pnand %p837_p9, %p833_p8 }
  0x3b   : > { %444 = vmatpush.msra.mxu2 %v394_v27  ;;  %402 = vmatpush.msra.mxu1 %v379_v29  ;;  %v291_v40 = vmax.f32 %v283_v37, 0.0  ;;  %v389_v41 = vld [vmem:[#allocation7 + $0xc0] sm:$0xff]  ;;  %v374_v42 = vld [vmem:[#allocation7 + $0x48] sm:$0xff]  ;;  %v388_v43 = vld [vmem:[#allocation7 + $0xb8] sm:$0xff] }
  0x3c   : > { %322 = vmatpush.msra.mxu0 %v305_v6  ;;  %625 = vmatpush.msra.mxu3 %v305_v6  ;;  %v373_v44 = vld [vmem:[#allocation7 + $0x40] sm:$0xff]  ;;  %v387_v45 = vld [vmem:[#allocation7 + $0xb0] sm:$0xff]  ;;  %v372_v46 = vld [vmem:[#allocation7 + $0x38] sm:$0xff] }
  0x3d   : > { %445 = vmatpush.msra.mxu2 %v393_v31  ;;  %403 = vmatpush.msra.mxu1 %v378_v32  ;;  %v284_v47 = vld [vmem:[%s1032_s28 + $0x20] sm:$0xff]  ;;  %v386_v48 = vld [vmem:[#allocation7 + $0xa8] sm:$0xff]  ;;  %v371_v49 = vld [vmem:[#allocation7 + $0x30] sm:$0xff] }
  0x3e   : > { %323 = vmatpush.msra.mxu0 %v304_v7  ;;  %626 = vmatpush.msra.mxu3 %v304_v7  ;;  %v292_v50 = vmax.f32 %v284_v47, 0.0  ;;  %v385_v51 = vld [vmem:[#allocation7 + $0xa0] sm:$0xff]  ;;  %v370_v52 = vld [vmem:[#allocation7 + $0x28] sm:$0xff]  ;;  %v384_v53 = vld [vmem:[#allocation7 + $0x98] sm:$0xff] }
  0x3f   : > { %446 = vmatpush.msra.mxu2 %v392_v33  ;;  %404 = vmatpush.msra.mxu1 %v377_v34  ;;  %v369_v54 = vld [vmem:[#allocation7 + $0x20] sm:$0xff]  ;;  %v383_v55 = vld [vmem:[#allocation7 + $0x90] sm:$0xff]  ;;  %v368_v56 = vld [vmem:[#allocation7 + $0x18] sm:$0xff] }
  0x40   : > { %324 = vmatpush.msra.mxu0 %v303_v8  ;;  %627 = vmatpush.msra.mxu3 %v303_v8  ;;  %v285_v57 = vld [vmem:[%s1032_s28 + $0x28] sm:$0xff]  ;;  %v381_v60 = vld [vmem:[#allocation7 + $0x80] sm:$0xff]  ;;  %v367_v61 = vld [vmem:[#allocation7 + $0x10] sm:$0xff] }
  0x41   : > { %447 = vmatpush.msra.mxu2 %v391_v35  ;;  %405 = vmatpush.msra.mxu1 %v376_v36  ;;  %v382_v58 = vld [vmem:[#allocation7 + $0x88] sm:$0xff]  ;;  %v293_v59 = vmax.f32 %v285_v57, 0.0  ;;  %v365_v63 = vld [vmem:[#allocation7] sm:$0xff] }
  0x42   : > { %325 = vmatpush.msra.mxu0 %v302_v9  ;;  %628 = vmatpush.msra.mxu3 %v302_v9  ;;  %v366_v62 = vld [vmem:[#allocation7 + $0x8] sm:$0xff]  ;;  %v722_v0 = vld [vmem:[%s1123_s2] ss:$0 sm:$0xff] }
  0x43   : > { %448 = vmatpush.msra.mxu2 %v390_v38  ;;  %406 = vmatpush.msra.mxu1 %v375_v39 }
  0x44   : > { %326 = vmatpush.msra.mxu0 %v301_v10  ;;  %629 = vmatpush.msra.mxu3 %v301_v10 }
  0x45   : > { %449 = vmatpush.msra.mxu2 %v389_v41  ;;  %407 = vmatpush.msra.mxu1 %v374_v42 }
  0x46   : > { %327 = vmatpush.msra.mxu0 %v300_v11  ;;  %630 = vmatpush.msra.mxu3 %v300_v11 }
  0x47   : > { %450 = vmatpush.msra.mxu2 %v388_v43  ;;  %408 = vmatpush.msra.mxu1 %v373_v44 }
  0x48   : > { %328 = vmatpush.msra.mxu0 %v299_v12  ;;  %631 = vmatpush.msra.mxu3 %v299_v12 }
  0x49   : > { %451 = vmatpush.msra.mxu2 %v387_v45  ;;  %409 = vmatpush.msra.mxu1 %v372_v46 }
  0x4a   : > { %329 = vmatpush.msra.mxu0 %v298_v13  ;;  %632 = vmatpush.msra.mxu3 %v298_v13 }
  0x4b   : > { %452 = vmatpush.msra.mxu2 %v386_v48  ;;  %410 = vmatpush.msra.mxu1 %v371_v49 }
  0x4c   : > { %330 = vmatpush.msra.mxu0 %v297_v16  ;;  %633 = vmatpush.msra.mxu3 %v297_v16 }
  0x4d   : > { %453 = vmatpush.msra.mxu2 %v385_v51  ;;  %411 = vmatpush.msra.mxu1 %v370_v52 }
  0x4e   : > { %331 = vmatpush.msra.mxu0 %v296_v17  ;;  %634 = vmatpush.msra.mxu3 %v296_v17 }
  0x4f   : > { %332 = vmatmul.f32.vlgmr.msra.gmra.mxu0 %v288_v18  ;;  %350 = vmatmul.f32.vlgmr.msra.gmra.mxu3 %v294_v19 }
  0x50   : > { %635 = vmatpush.msrb.mxu3 %v380_v28  ;;  %454 = vmatpush.msra.mxu2 %v384_v53 }
  0x51   : > { %412 = vmatpush.msra.mxu1 %v369_v54 }
  0x52   : > { %636 = vmatpush.msrb.mxu3 %v379_v29  ;;  %455 = vmatpush.msra.mxu2 %v383_v55 }
  0x53   : > { %413 = vmatpush.msra.mxu1 %v368_v56 }
  0x54   : > { %637 = vmatpush.msrb.mxu3 %v378_v32  ;;  %456 = vmatpush.msra.mxu2 %v382_v58 }
  0x55   : > { %414 = vmatpush.msra.mxu1 %v367_v61 }
  0x56   : > { %638 = vmatpush.msrb.mxu3 %v377_v34  ;;  %457 = vmatpush.msra.mxu2 %v381_v60 }
  0x57   : > { %335 = vmatmul.f32.gmra.mxu0 %v289_v22  ;;  %353 = vmatmul.f32.gmra.mxu3 %v295_v23 }
  0x58   : > { %639 = vmatpush.msrb.mxu3 %v376_v36  ;;  %458 = vmatmul.f32.vlgmr.msra.gmra.mxu2 %v1043_v14 }
  0x59   : > { %415 = vmatpush.msra.mxu1 %v366_v62 }
  0x5a   : > { %640 = vmatpush.msrb.mxu3 %v375_v39 }
  0x5b   : > { %416 = vmatpush.msra.mxu1 %v365_v63 }
  0x5c   : > { %641 = vmatpush.msrb.mxu3 %v374_v42 }
  0x5e   : > { %642 = vmatpush.msrb.mxu3 %v373_v44 }
  0x5f   : > { %338 = vmatmul.f32.gmra.mxu0 %v290_v30  ;;  %v723_v30 = vld [vmem:[%s1125_s4] ss:$0 sm:$0xff] }
  0x60   : > { %643 = vmatpush.msrb.mxu3 %v372_v46  ;;  %461 = vmatmul.f32.gmra.mxu2 %v1051_v20 }
  0x62   : > { %644 = vmatpush.msrb.mxu3 %v371_v49 }
  0x64   : > { %645 = vmatpush.msrb.mxu3 %v370_v52 }
  0x66   : > { %646 = vmatpush.msrb.mxu3 %v369_v54 }
  0x67   : > { %341 = vmatmul.f32.gmra.mxu0 %v291_v40 }
  0x68   : > { %647 = vmatpush.msrb.mxu3 %v368_v56  ;;  %464 = vmatmul.f32.gmra.mxu2 %v1059_v26 }
  0x6a   : > { %648 = vmatpush.msrb.mxu3 %v367_v61 }
  0x6c   : > { %649 = vmatpush.msrb.mxu3 %v366_v62 }
  0x6e   : > { %650 = vmatpush.msrb.mxu3 %v365_v63 }
  0x6f   : > { %344 = vmatmul.f32.gmra.mxu0 %v292_v50 }
  0x70   : > { %467 = vmatmul.f32.gmra.mxu2 %v283_v37 }
  0x77   : > { %347 = vmatmul.f32.gmra.mxu0 %v293_v59 }
  0x78   : > { %470 = vmatmul.f32.gmra.mxu2 %v284_v47 }
  0x80   : > { %473 = vmatmul.f32.gmra.mxu2 %v285_v57 }
  0x88   : > { %476 = vmatmul.f32.gmra.mxu2 %v1046_v15 }
  0x90   : > { %479 = vmatmul.f32.gmra.mxu2 %v1054_v21 }
  0xcc   : > { %v333_v1 = vpop.f32.mrf.mxu0 }
  0xcd   : > { %v334_v2 = vadd.f32 %v722_v0, %v333_v1 }
  0xcf   : > { %v357_v3 = vmax.f32 %v334_v2, 0.0 }
  0xd1   : > { %417 = vmatmul.f32.vlgmr.msra.gmra.mxu1 %v357_v3 }
  0xd2   : > { %v351_v4 = vpop.f32.mrf.mxu3 }
  0xd3   : > { %v352_v23 = vadd.f32 %v722_v0, %v351_v4 }
  0xd4   : > { %v336_v5 = vpop.f32.mrf.mxu0 }
  0xd5   : > { %v337_v6 = vadd.f32 %v722_v0, %v336_v5  ;;  %v363_v24 = vmax.f32 %v352_v23, 0.0 }
  0xd7   : > { %v358_v7 = vmax.f32 %v337_v6, 0.0 }
  0xd9   : > { %420 = vmatmul.f32.gmra.mxu1 %v358_v7 }
  0xda   : > { %v354_v8 = vpop.f32.mrf.mxu3 }
  0xdb   : > { %v355_v9 = vadd.f32 %v722_v0, %v354_v8  ;;  %v459_v25 = vpop.f32.mrf.mxu2 }
  0xdc   : > { %v339_v10 = vpop.f32.mrf.mxu0 }
  0xdd   : > { %v340_v11 = vadd.f32 %v722_v0, %v339_v10  ;;  %v364_v12 = vmax.f32 %v355_v9, 0.0 }
  0xdf   : > { %v359_v13 = vmax.f32 %v340_v11, 0.0  ;;  %438 = vmatmul.f32.vlgmr.msrb.gmra.mxu3 %v364_v12 }
  0xe1   : > { %423 = vmatmul.f32.gmra.mxu1 %v359_v13 }
  0xe3   : > { %v462_v26 = vpop.f32.mrf.mxu2 }
  0xe4   : > { %v342_v14 = vpop.f32.mrf.mxu0 }
  0xe5   : > { %v343_v15 = vadd.f32 %v722_v0, %v342_v14 }
  0xe7   : > { %v360_v16 = vmax.f32 %v343_v15, 0.0 }
  0xe9   : > { %426 = vmatmul.f32.gmra.mxu1 %v360_v16 }
  0xeb   : > { %v465_v27 = vpop.f32.mrf.mxu2 }
  0xec   : > { %v345_v17 = vpop.f32.mrf.mxu0 }
  0xed   : > { %v346_v18 = vadd.f32 %v722_v0, %v345_v17 }
  0xef   : > { %v361_v19 = vmax.f32 %v346_v18, 0.0 }
  0xf1   : > { %429 = vmatmul.f32.gmra.mxu1 %v361_v19 }
  0xf3   : > { %v468_v28 = vpop.f32.mrf.mxu2 }
  0xf4   : > { %v348_v20 = vpop.f32.mrf.mxu0 }
  0xf5   : > { %v349_v21 = vadd.f32 %v722_v0, %v348_v20 }
  0xf7   : > { %v362_v22 = vmax.f32 %v349_v21, 0.0 }
  0xf9   : > { %432 = vmatmul.f32.gmra.mxu1 %v362_v22 }
  0xfb   : > { %v471_v29 = vpop.f32.mrf.mxu2 }
 0x101   : > { %435 = vmatmul.f32.gmra.mxu1 %v363_v24 }
 0x103   : > { %v474_v33 = vpop.f32.mrf.mxu2 }
 0x10b   : > { %v477_v37 = vpop.f32.mrf.mxu2 }
 0x113   : > { %v480_v43 = vpop.f32.mrf.mxu2 }
 0x14e   : > { %v418_v31 = vpop.f32.mrf.mxu1 }
 0x14f   : > { %v419_v32 = vadd.f32 %v723_v30, %v418_v31 }
 0x151   : > { %v460_v34 = vadd.f32 %v459_v25, %v419_v32 }
 0x153   : > { %483 = vst [vmem:[%s1078_s12] sm:$0xff] %v460_v34 }
 0x156   : > { %v421_v35 = vpop.f32.mrf.mxu1 }
 0x157   : > { %v422_v36 = vadd.f32 %v723_v30, %v421_v35 }
 0x159   : > { %v463_v38 = vadd.f32 %v462_v26, %v422_v36 }
 0x15b   : > { %484 = vst [vmem:[%s1078_s12 + $0x8] sm:$0xff] %v463_v38 }
 0x15e   : > { %v424_v39 = vpop.f32.mrf.mxu1 }
 0x15f   : > { %v425_v40 = vadd.f32 %v723_v30, %v424_v39 }
 0x161   : > { %v466_v41 = vadd.f32 %v465_v27, %v425_v40 }
 0x162   : > { %v439_v42 = vpop.f32.mrf.mxu3 }
 0x163   : > { %485 = vst [vmem:[%s1078_s12 + $0x10] sm:$0xff] %v466_v41  ;;  %v440_v44 = vadd.f32 %v723_v30, %v439_v42 }
 0x165   : > { %v481_v45 = vadd.f32 %v480_v43, %v440_v44 }
 0x166   : > { %v427_v46 = vpop.f32.mrf.mxu1 }
 0x167   : > { %v428_v47 = vadd.f32 %v723_v30, %v427_v46  ;;  %490 = vst [vmem:[%s1078_s12 + $0x38] sm:$0xff] %v481_v45 }
 0x169   : > { %v469_v48 = vadd.f32 %v468_v28, %v428_v47 }
 0x16b   : > { %486 = vst [vmem:[%s1078_s12 + $0x18] sm:$0xff] %v469_v48 }
 0x16e   : > { %v430_v49 = vpop.f32.mrf.mxu1 }
 0x16f   : > { %v431_v50 = vadd.f32 %v723_v30, %v430_v49 }
 0x171   : > { %v472_v51 = vadd.f32 %v471_v29, %v431_v50 }
 0x173   : > { %487 = vst [vmem:[%s1078_s12 + $0x20] sm:$0xff] %v472_v51 }
 0x176   : > { %v433_v52 = vpop.f32.mrf.mxu1 }
 0x177   : > { %v434_v53 = vadd.f32 %v723_v30, %v433_v52 }
 0x179   : > { %v475_v54 = vadd.f32 %v474_v33, %v434_v53 }
 0x17b   : > { %488 = vst [vmem:[%s1078_s12 + $0x28] sm:$0xff] %v475_v54 }
 0x17e   : > { %v436_v55 = vpop.f32.mrf.mxu1 }
 0x17f   : > { %v437_v56 = vadd.f32 %v723_v30, %v436_v55 }
 0x181   : > { %v478_v57 = vadd.f32 %v477_v37, %v437_v56 }
 0x183   : > { %489 = vst [vmem:[%s1078_s12 + $0x30] sm:$0xff] %v478_v57 }
 0x184   : > { %841 = shalt.err (!%p838_p10)
}
 0x185   : > { %s890_s8 = smov 128   ;;  %s891_s9 = smov 8  }
 0x186   : > { %661 = dma.vmem_to_hbm [thread:$0]  (%p993_p0), %s505_s6, 1024, %s507_s7, %s492_s26, %s890_s8, %s890_s8, %s891_s9  }
 0x187 PF: > { %p683_p11 = scmp.ge.s32.totalorder %s884_s21, 2  ;;  %s521_s12 = sand.u32 1, %s872_s18  }
 0x188   : > { %s522_s13 = scalar_lea.sflag [#allocation4], %s521_s12 }
 0x189   : > { %p675_p12 = pnand %p683_p11, %p957_p6 }
 0x18b   : > { %p676_p13 = pneg %p675_p12 }
 0x18d   : > { %867 = dma.done.wait (%p676_p13), %s522_s13, 1024  }
 0x18e   : > { %869 = vsyncadd (%p676_p13), %s522_s13, 4294966272  ;;  %p19_p3 = scmp.ge.s32.totalorder %s983_s14, 7   ;;  %s1134_s18 = smov %s876_s19 }
 0x18f   : > { %s1135_s19 = smov %s880_s20  ;;  %s1136_s20 = smov %s999_s23 }
 0x190   : > { %s1137_s21 = smov %s983_s14  ;;  %21 = sbr.rel (!%p19_p3) target bundleno = 6 (0x6), region = 93 }
 0x195   :  { %528 = vsyncpa [#allocation3], 1 }
 0x196   :  { %530 = vsyncpa [#allocation3 + $0x1], 1 }
 0x197   :  { %531 = vsyncpa [#allocation6], 1 }
 0x198   :  { %532 = vsyncpa [#allocation4], 1 }
 0x199   :  { %534 = vsyncpa [#allocation4 + $0x1], 1 }

</bundles_post_ra>
